<compile_context>
chip_gen: v7x
topology: tpu7x:2x2x1
jax: 0.10.0
libtpu: 0.0.40
codegen_flags: <defaults>
</compile_context>

<pallas_src>
import functools

import jax
import jax.numpy as jnp
from jax.experimental import pallas as pl
from jax.experimental.pallas import tpu as pltpu

LANE = 128
SUBLANE = 8
MAX_TILE_ROWS = 4096   # (4096,128) f32 = 2 MiB/block
NUM_PARALLEL = 2       # v7x has 2 TensorCores; runs sequentially on v5e/v6e


def _pow_gamma(fw, gamma):
    """fw ** gamma, unrolled into multiplies for small integer gamma."""
    g_int = int(gamma)
    if float(gamma) == float(g_int) and 0 <= g_int <= 8:
        if g_int == 0:
            return jnp.ones_like(fw)
        out = fw
        for _ in range(g_int - 1):
            out = out * fw
        return out
    # TODO(synk): clamp fw to eps if fractional gamma with fw == 0 matters.
    return fw ** gamma


def _tile_partial(x_ref, t_ref, alpha, gamma, valid_rows):
    """Per-tile focal-loss contribution reduced to an (8, LANE) vreg."""
    x = x_ref[...].astype(jnp.float32)
    t = t_ref[...].astype(jnp.float32)

    e = jnp.exp(-jnp.abs(x))                               # EUP, reused twice
    bce = jnp.maximum(x, 0.0) - x * t + jnp.log1p(e)
    inv = pl.reciprocal(1.0 + e, approx=True)              # EUP slot, not VALU
    probs = jnp.where(x >= 0.0, inv, e * inv)              # == sigmoid(x)

    is_pos = t == 1.0
    alpha_factor = jnp.where(is_pos, alpha, 1.0 - alpha)
    fw = jnp.where(is_pos, 1.0 - probs, probs)
    loss = bce * alpha_factor * _pow_gamma(fw, gamma)

    if valid_rows is not None:
        # Row-level mask, only traced for the single partial tail tile.
        # Select does not propagate NaN/Inf from the unselected branch, so
        # garbage rows in the partial block cannot reach the accumulator.
        rid = jax.lax.broadcasted_iota(jnp.int32, loss.shape, 0)
        loss = jnp.where(rid < valid_rows, loss, 0.0)

    tr, ln = loss.shape
    # Sublane-preserving reduce: pure vreg adds, no per-step XLU reduce.
    return jnp.sum(loss.reshape(tr // SUBLANE, SUBLANE, ln), axis=0)


def _focal_loss_kernel(x_ref, t_ref, out_ref, *, alpha, gamma,
                       tiles_per_core, num_tiles, tail_rows, has_excess):
    p = pl.program_id(0)          # parallel axis (TensorCore split on v7x)
    j = pl.program_id(1)          # sequential reduction axis
    g = p * tiles_per_core + j    # global tile index

    # Per-core accumulator lives in the resident output block (same block
    # index for every j), initialized at the start of each core's j-loop.
    @pl.when(j == 0)
    def _():
        out_ref[...] = jnp.zeros_like(out_ref)

    if tail_rows is None and not has_excess:
        # Fully regular case: no masking anywhere.
        out_ref[...] += _tile_partial(x_ref, t_ref, alpha, gamma, None)
    else:
        full_bound = num_tiles - 1 if tail_rows is not None else num_tiles

        @pl.when(g < full_bound)            # fast, unmasked interior tiles
        def _():
            out_ref[...] += _tile_partial(x_ref, t_ref, alpha, gamma, None)

        if tail_rows is not None:
            @pl.when(g == num_tiles - 1)    # masked tail tile only
            def _():
                out_ref[...] += _tile_partial(x_ref, t_ref, alpha, gamma,
                                              tail_rows)
        # Tiles with g >= num_tiles (excess steps of the 2-D split) simply
        # skip accumulation; their DMA is clamped to the last real tile.


def _focal_elem_sum(x, t, alpha, gamma):
    """Plain-JAX focal-loss sum for the (<1024-element) ragged tail."""
    x = x.astype(jnp.float32)
    t = t.astype(jnp.float32)
    bce = jnp.maximum(x, 0.0) - x * t + jnp.log1p(jnp.exp(-jnp.abs(x)))
    probs = jax.nn.sigmoid(x)
    is_pos = t == 1.0
    af = jnp.where(is_pos, alpha, 1.0 - alpha)
    fw = jnp.where(is_pos, 1.0 - probs, probs)
    return jnp.sum(bce * af * (fw ** gamma))


def focal_loss(inputs, targets, alpha=1.0, gamma=2.0):
    """Pallas equivalent of FocalLoss(alpha, gamma)(inputs, targets)."""
    B = inputs.shape[0]
    alpha = float(alpha)
    gamma = float(gamma)

    # Keep caller-native dtypes; upcast happens inside the kernel.
    x = inputs.reshape(-1)
    t = targets.reshape(-1)
    n = x.shape[0]

    tile_elems = SUBLANE * LANE
    n_bulk = n - (n % tile_elems)

    total = jnp.zeros((), jnp.float32)

    if n_bulk > 0:
        rows = n_bulk // LANE                        # multiple of 8
        tile_rows = min(MAX_TILE_ROWS, rows)         # multiple of 8 (or full dim)
        num_tiles = (rows + tile_rows - 1) // tile_rows
        n_par = min(NUM_PARALLEL, num_tiles)
        tiles_per_core = (num_tiles + n_par - 1) // n_par
        has_excess = n_par * tiles_per_core > num_tiles
        last_rows = rows - (num_tiles - 1) * tile_rows
        tail_rows = None if last_rows == tile_rows else last_rows

        xb = x if n_bulk == n else x[:n_bulk]
        tb = t if n_bulk == n else t[:n_bulk]
        x2 = xb.reshape(rows, LANE)
        t2 = tb.reshape(rows, LANE)

        if has_excess:
            def in_map(p_, j_):
                return (jnp.minimum(p_ * tiles_per_core + j_, num_tiles - 1), 0)
        else:
            def in_map(p_, j_):
                return (p_ * tiles_per_core + j_, 0)

        kernel = functools.partial(
            _focal_loss_kernel,
            alpha=alpha, gamma=gamma,
            tiles_per_core=tiles_per_core, num_tiles=num_tiles,
            tail_rows=tail_rows, has_excess=has_excess,
        )

        cost = pl.CostEstimate(
            flops=22 * n_bulk,
            transcendentals=3 * n_bulk,
            bytes_accessed=(n_bulk * (x2.dtype.itemsize + t2.dtype.itemsize)
                            + n_par * SUBLANE * LANE * 4),
        )

        partials = pl.pallas_call(
            kernel,
            out_shape=jax.ShapeDtypeStruct((n_par * SUBLANE, LANE), jnp.float32),
            grid_spec=pltpu.PrefetchScalarGridSpec(
                num_scalar_prefetch=0,
                grid=(n_par, tiles_per_core),
                in_specs=[
                    pl.BlockSpec((tile_rows, LANE), in_map),
                    pl.BlockSpec((tile_rows, LANE), in_map),
                ],
                out_specs=pl.BlockSpec((SUBLANE, LANE), lambda p_, j_: (p_, 0)),
            ),
            compiler_params=pltpu.CompilerParams(
                dimension_semantics=("parallel", "arbitrary")),
            cost_estimate=cost,
        )(x2, t2)

        total = jnp.sum(partials)

    if n_bulk < n:
        # Ragged (<8*128 element) tail handled in plain JAX instead of a
        # whole-array jnp.pad copy through HBM.
        total = total + _focal_elem_sum(x[n_bulk:], t[n_bulk:], alpha, gamma)

    return total / jnp.float32(B)


def _focal_loss_ref(inputs, targets, alpha=1.0, gamma=2.0):
    x = inputs.astype(jnp.float32)
    t = targets.astype(jnp.float32)
    bce = jnp.maximum(x, 0.0) - x * t + jnp.log1p(jnp.exp(-jnp.abs(x)))
    probs = jax.nn.sigmoid(x)
    is_pos = t == 1.0
    alpha_factor = jnp.where(is_pos, alpha, 1.0 - alpha)
    focal_weight = jnp.where(is_pos, 1.0 - probs, probs)
    focal_weight = alpha_factor * (focal_weight ** gamma)
    return jnp.sum(bce * focal_weight) / inputs.shape[0]


if __name__ == "__main__":
    key = jax.random.PRNGKey(0)
    k1, k2 = jax.random.split(key)

    # Small shapes consistent with a detection-style logits map (NCHW).
    B, C, H, W = 2, 4, 16, 16
    inputs = jax.random.normal(k1, (B, C, H, W), dtype=jnp.float32)
    targets = (jax.random.uniform(k2, (B, C, H, W)) > 0.8).astype(jnp.float32)

    loss = focal_loss(inputs, targets, alpha=1.0, gamma=2.0)
    loss = jax.block_until_ready(loss)

    ref = _focal_loss_ref(inputs, targets, alpha=1.0, gamma=2.0)
    # Slightly looser rtol: the kernel uses the approx EUP reciprocal for the
    # sigmoid (a few-ULP-to-~1e-4 relative difference vs exact divide).
    assert jnp.allclose(loss, ref, rtol=2e-3, atol=1e-5), (loss, ref)

    print("KERNEL_OK")
</pallas_src>

<mosaic_0001>
module attributes {stable_mosaic.version = 11 : i64} {
  func.func @_focal_loss_kernel(%arg0: i32, %arg1: i32, %arg2: memref<16x128xf32, #tpu.memory_space<vmem>>, %arg3: memref<16x128xf32, #tpu.memory_space<vmem>>, %arg4: memref<8x128xf32, #tpu.memory_space<vmem>>) attributes {dimension_semantics = [#tpu.dimension_semantics<parallel>, #tpu.dimension_semantics<arbitrary>], iteration_bounds = array<i64: 1, 1>, scalar_prefetch = 0 : i64, scratch_operands = 0 : i64, tpu.core_type = #tpu.core_type<tc>, window_params = [{transform_indices = @transform_0, window_bounds = array<i64: 16, 128>}, {transform_indices = @transform_1, window_bounds = array<i64: 16, 128>}, {transform_indices = @transform_2, window_bounds = array<i64: 8, 128>}]} {
    %c0_i32 = arith.constant 0 : i32
    %0 = arith.cmpi eq, %arg1, %c0_i32 : i32
    %1 = arith.extui %0 : i1 to i32
    %c0_i32_0 = arith.constant 0 : i32
    %2 = arith.cmpi ne, %1, %c0_i32_0 : i32
    scf.if %2 {
      %cst_16 = arith.constant 0.000000e+00 : f32
      %38 = vector.broadcast %cst_16 : f32 to vector<8x128xf32>
      %c0_17 = arith.constant 0 : index
      %c0_18 = arith.constant 0 : index
      %39 = vector.load %arg4[%c0_17, %c0_18] : memref<8x128xf32, #tpu.memory_space<vmem>>, vector<8x128xf32>
      tpu.vector_store %arg4[%c0_17, %c0_18], %38 {strides = array<i32>} : memref<8x128xf32, #tpu.memory_space<vmem>>, vector<8x128xf32>,
    } else {
    }
    %c0 = arith.constant 0 : index
    %c0_1 = arith.constant 0 : index
    %3 = vector.load %arg4[%c0, %c0_1] : memref<8x128xf32, #tpu.memory_space<vmem>>, vector<8x128xf32>
    %c0_2 = arith.constant 0 : index
    %c0_3 = arith.constant 0 : index
    %4 = vector.load %arg2[%c0_2, %c0_3] : memref<16x128xf32, #tpu.memory_space<vmem>>, vector<16x128xf32>
    %c0_4 = arith.constant 0 : index
    %c0_5 = arith.constant 0 : index
    %5 = vector.load %arg3[%c0_4, %c0_5] : memref<16x128xf32, #tpu.memory_space<vmem>>, vector<16x128xf32>
    %6 = math.absf %4 : vector<16x128xf32>
    %cst = arith.constant 0.000000e+00 : f32
    %7 = vector.broadcast %cst : f32 to vector<16x128xf32>
    %8 = arith.subf %7, %6 : vector<16x128xf32>
    %9 = math.exp %8 : vector<16x128xf32>
    %cst_6 = arith.constant 0.000000e+00 : f32
    %10 = vector.broadcast %cst_6 : f32 to vector<16x128xf32>
    %11 = arith.maximumf %4, %10 : vector<16x128xf32>
    %12 = arith.mulf %4, %5 : vector<16x128xf32>
    %13 = arith.subf %11, %12 : vector<16x128xf32>
    %14 = math.log1p %9 : vector<16x128xf32>
    %15 = arith.addf %13, %14 : vector<16x128xf32>
    %cst_7 = arith.constant 1.000000e+00 : f32
    %16 = vector.broadcast %cst_7 : f32 to vector<16x128xf32>
    %17 = arith.addf %16, %9 : vector<16x128xf32>
    %18 = tpu.reciprocal %17 {approx = true} : vector<16x128xf32> -> vector<16x128xf32>
    %cst_8 = arith.constant 0.000000e+00 : f32
    %19 = vector.broadcast %cst_8 : f32 to vector<16x128xf32>
    %20 = arith.cmpf oge, %4, %19 : vector<16x128xf32>
    %21 = arith.mulf %9, %18 : vector<16x128xf32>
    %22 = arith.select %20, %18, %21 : vector<16x128xi1>, vector<16x128xf32>
    %cst_9 = arith.constant 1.000000e+00 : f32
    %23 = vector.broadcast %cst_9 : f32 to vector<16x128xf32>
    %24 = arith.cmpf oeq, %5, %23 : vector<16x128xf32>
    %cst_10 = arith.constant 1.000000e+00 : f32
    %cst_11 = arith.constant 0.000000e+00 : f32
    %25 = vector.broadcast %cst_10 : f32 to vector<16x128xf32>
    %26 = vector.broadcast %cst_11 : f32 to vector<16x128xf32>
    %27 = arith.select %24, %25, %26 : vector<16x128xi1>, vector<16x128xf32>
    %cst_12 = arith.constant 1.000000e+00 : f32
    %28 = vector.broadcast %cst_12 : f32 to vector<16x128xf32>
    %29 = arith.subf %28, %22 : vector<16x128xf32>
    %30 = arith.select %24, %29, %22 : vector<16x128xi1>, vector<16x128xf32>
    %31 = arith.mulf %15, %27 : vector<16x128xf32>
    %32 = arith.mulf %30, %30 : vector<16x128xf32>
    %33 = arith.mulf %31, %32 : vector<16x128xf32>
    %34 = vector.shape_cast %33 : vector<16x128xf32> to vector<2x8x128xf32>
    %cst_13 = arith.constant dense<0.000000e+00> : vector<8x128xf32>
    %35 = vector.multi_reduction <add>, %34, %cst_13 [0] : vector<2x8x128xf32> to vector<8x128xf32>
    %36 = arith.addf %3, %35 : vector<8x128xf32>
    %c0_14 = arith.constant 0 : index
    %c0_15 = arith.constant 0 : index
    %37 = vector.load %arg4[%c0_14, %c0_15] : memref<8x128xf32, #tpu.memory_space<vmem>>, vector<8x128xf32>
    tpu.vector_store %arg4[%c0_14, %c0_15], %36 {strides = array<i32>} : memref<8x128xf32, #tpu.memory_space<vmem>>, vector<8x128xf32>,
    return
  }
  func.func @transform_0(%arg0: i32, %arg1: i32) -> (i32, i32) {
    %c1_i32 = arith.constant 1 : i32
    %0 = arith.muli %arg0, %c1_i32 : i32
    %1 = arith.addi %0, %arg1 : i32
    %c0_i32 = arith.constant 0 : i32
    %c0_i32_0 = arith.constant 0 : i32
    return %1, %c0_i32 : i32, i32
  }
  func.func @transform_1(%arg0: i32, %arg1: i32) -> (i32, i32) {
    %c1_i32 = arith.constant 1 : i32
    %0 = arith.muli %arg0, %c1_i32 : i32
    %1 = arith.addi %0, %arg1 : i32
    %c0_i32 = arith.constant 0 : i32
    %c0_i32_0 = arith.constant 0 : i32
    return %1, %c0_i32 : i32, i32
  }
  func.func @transform_2(%arg0: i32, %arg1: i32) -> (i32, i32) {
    %c0_i32 = arith.constant 0 : i32
    %c0_i32_0 = arith.constant 0 : i32
    return %arg0, %c0_i32 : i32, i32
  }
}

</mosaic_0001>

<bundles_post_ra>
// kernel: tpu_custom_call.1
= control target key start
LH: loop header
LB: loop body
LE: loop exit
PB: predicated region body
PF: predicated region fallthrough
CT: control target
= control target key end

     0   :  { %7 = vsyncpa [#allocation3], 0  ;;  %s296_s0 = inlined_call_operand.hbm [shape: f32[16,128], index: 0, kind: input, shape index: {}]   ;;  %s297_s1 = inlined_call_operand.hbm [shape: f32[16,128], index: 1, kind: input, shape index: {}]   ;;  %s298_s2 = inlined_call_operand.hbm [shape: f32[8,128], index: 2, kind: output, shape index: {}]  }
   0x1   :  { %8 = vsyncpa [#allocation6], 0 }
   0x2   :  { %9 = vsyncpa [#allocation4], 0  ;;  %s229_s9 = smov [#allocation2]   ;;  %s157_s13 = scalar_lea.hbm %s296_s0, 256 }
   0x3   :  { %s19_s10 = sshll.u32 %s229_s9, 4  ;;  %p158_p0 = scmp.ne.s32.totalorder %s296_s0, %s157_s13  ;;  %s20_s10 = int_to_ptr.vmem [resolvable:$true] %s19_s10 }
   0x4   :  { %p161_p1 = scmp.lt.u32.totalorder %s157_s13, %s296_s0 }
   0x6   :  { %p163_p2 = pnand %p161_p1, %p158_p0 }
   0x8   :  { %166 = shalt.err (!%p163_p2)
}
   0x9   :  { %s167_s18 = scalar_lea.vmem %s20_s10, 256  ;;  %p172_p4 = scmp.lt.s32.totalorder %s20_s10, %s20_s10 }
   0xa   :  { %p168_p3 = scmp.ne.s32.totalorder %s20_s10, %s167_s18  ;;  %p173_p5 = scmp.lt.s32.totalorder %s167_s18, %s167_s18 }
   0xc   :  { %p174_p6 = por %p173_p5, %p172_p4 }
   0xe   :  { %p175_p7 = pnand %p174_p6, %p168_p3 }
  0x10   :  { %178 = shalt.err (!%p175_p7)
}
  0x11   :  { %s230_s19 = smov 128   ;;  %s231_s20 = smov 8  }
  0x12   :  { %25 = dma.hbm_to_vmem [thread:$0]  %s296_s0, 256, %s20_s10, [#allocation3], %s230_s19, %s230_s19, %s231_s20  }
  0x13   :  { %s232_s23 = smov [#allocation5]   ;;  %s179_s27 = scalar_lea.hbm %s297_s1, 256 }
  0x14   :  { %s35_s24 = sshll.u32 %s232_s23, 4  ;;  %p180_p8 = scmp.ne.s32.totalorder %s297_s1, %s179_s27  ;;  %s36_s24 = int_to_ptr.vmem [resolvable:$true] %s35_s24 }
  0x15   :  { %p183_p9 = scmp.lt.u32.totalorder %s179_s27, %s297_s1 }
  0x17   :  { %p185_p10 = pnand %p183_p9, %p180_p8 }
  0x19   :  { %188 = shalt.err (!%p185_p10)
}
  0x1a   :  { %s189_s4 = scalar_lea.vmem %s36_s24, 256  ;;  %p194_p12 = scmp.lt.s32.totalorder %s36_s24, %s36_s24 }
  0x1b   :  { %p190_p11 = scmp.ne.s32.totalorder %s36_s24, %s189_s4  ;;  %p195_p13 = scmp.lt.s32.totalorder %s189_s4, %s189_s4 }
  0x1d   :  { %p196_p0 = por %p195_p13, %p194_p12 }
  0x1f   :  { %p197_p1 = pnand %p196_p0, %p190_p11 }
  0x21   :  { %200 = shalt.err (!%p197_p1)
}
  0x22   :  { %41 = dma.hbm_to_vmem [thread:$0]  %s297_s1, 256, %s36_s24, [#allocation6], %s230_s19, %s230_s19, %s231_s20  }
  0x23   :  { %223 = dma.done.wait [#allocation3], 256  }
  0x24   :  { %224 = vsyncadd [#allocation3], 4294967040 }
  0x25   :  { %225 = dma.done.wait [#allocation6], 256  }
  0x26   :  { %226 = vsyncadd [#allocation6], 4294967040  ;;  %v58_v0 = vld [vmem:[#allocation2] sm:$0xff]  ;;  %v59_v1 = vld [vmem:[#allocation2 + $0x8] sm:$0xff]  ;;  %v233_v40 = vmov 0.0   ;;  %s234_s1 = smov [#allocation7]  }
  0x27   :  { %v62_v2 = vand.u32 2147483647, %v58_v0  ;;  %v63_v3 = vand.u32 2147483647, %v59_v1  ;;  %v60_v14 = vld [vmem:[#allocation5] sm:$0xff]  ;;  %v61_v15 = vld [vmem:[#allocation5 + $0x8] sm:$0xff] }
  0x28   :  { %v70_v17 = vmax.f32 %v58_v0, 0.0  ;;  %v72_v18 = vmul.f32 %v60_v14, %v58_v0  ;;  %v71_v21 = vmax.f32 %v59_v1, 0.0  ;;  %v73_v22 = vmul.f32 %v61_v15, %v59_v1  ;;  %s129_s6 = sshll.u32 %s234_s1, 4  ;;  %s130_s6 = int_to_ptr.vmem [resolvable:$true] %s129_s6 }
  0x29   :  { %v64_v4 = vsub.f32 0.0, %v62_v2  ;;  %v65_v5 = vsub.f32 0.0, %v63_v3  ;;  %vm106_vm2 = vcmp.eq.f32.partialorder %v60_v14, 1.0  ;;  %vm100_vm3 = vcmp.ge.f32.partialorder %v58_v0, 0.0  ;;  %s201_s7 = scalar_lea.vmem %s130_s6, 128  ;;  %p206_p3 = scmp.lt.s32.totalorder %s130_s6, %s130_s6 }
  0x2a   :  { %v74_v26 = vsub.f32 %v70_v17, %v72_v18  ;;  %v75_v30 = vsub.f32 %v71_v21, %v73_v22  ;;  %vm107_vm4 = vcmp.eq.f32.partialorder %v61_v15, 1.0  ;;  %vm101_vm5 = vcmp.ge.f32.partialorder %v59_v1, 0.0  ;;  %p202_p2 = scmp.ne.s32.totalorder %s130_s6, %s201_s7  ;;  %p207_p4 = scmp.lt.s32.totalorder %s201_s7, %s201_s7 }
  0x2b   :  { %v66_v6 = vmul.f32 1.442695, %v64_v4  ;;  %v68_v7 = vmul.f32 1.442695, %v65_v5  ;;  %v108_v41 = vsel %vm106_vm2, 1.0, %v233_v40  ;;  %v109_v44 = vsel %vm107_vm4, 1.0, %v233_v40 }
  0x2c   :  { %p208_p5 = por %p207_p4, %p206_p3 }
  0x2d   :  { %145 = vpow2.f32 %v66_v6 }
  0x2e   :  { %147 = vpow2.f32 %v68_v7  ;;  %p209_p6 = pnand %p208_p5, %p202_p2 }
  0x37   :  { %v146_v8 = vpop.eup %145 }
  0x38   :  { %v148_v9 = vpop.eup %147  ;;  %v76_v10 = vadd.f32 1.0, %v146_v8  ;;  %v79_v12 = vmul.f32 -0.5, %v146_v8  ;;  %v82_v19 = vand.u32 2147483647, %v146_v8 }
  0x39   :  { %v85_v11 = vadd.f32 1.0, %v148_v9  ;;  %v88_v13 = vmul.f32 -0.5, %v148_v9  ;;  %v91_v23 = vand.u32 2147483647, %v148_v9 }
  0x3a   :  { %149 = vlog2.f32 %v76_v10  ;;  %v80_v16 = vadd.f32 1.0, %v79_v12  ;;  %vm274_vm0 = vcmp.lt.f32.partialorder %v82_v19, 0.0004427343 }
  0x3b   :  { %151 = vlog2.f32 %v85_v11  ;;  %v89_v20 = vadd.f32 1.0, %v88_v13  ;;  %vm92_vm1 = vcmp.lt.f32.partialorder %v91_v23, 0.0004427343 }
  0x3c   :  { %153 = vrcp.f32 %v76_v10  ;;  %v81_v24 = vmul.f32 %v146_v8, %v80_v16 }
  0x3d   :  { %155 = vrcp.f32 %v85_v11  ;;  %v90_v28 = vmul.f32 %v148_v9, %v89_v20 }
  0x44   :  { %v150_v25 = vpop.eup %149 }
  0x45   :  { %v152_v29 = vpop.eup %151  ;;  %v78_v31 = vmul.f32 0.6931472, %v150_v25 }
  0x46   :  { %v154_v32 = vpop.eup %153  ;;  %v87_v33 = vmul.f32 0.6931472, %v152_v29 }
  0x47   :  { %v156_v34 = vpop.eup %155  ;;  %v84_v35 = vsel %vm274_vm0, %v81_v24, %v78_v31  ;;  %v102_v36 = vmul.f32 %v154_v32, %v146_v8 }
  0x48   :  { %v93_v37 = vsel %vm92_vm1, %v90_v28, %v87_v33  ;;  %v94_v38 = vadd.f32 %v84_v35, %v74_v26  ;;  %v103_v39 = vmul.f32 %v156_v34, %v148_v9 }
  0x49   :  { %v95_v42 = vadd.f32 %v93_v37, %v75_v30  ;;  %v104_v43 = vsel %vm100_vm3, %v154_v32, %v102_v36 }
  0x4a   :  { %v105_v45 = vsel %vm101_vm5, %v156_v34, %v103_v39  ;;  %v110_v46 = vsub.f32 1.0, %v104_v43  ;;  %v114_v48 = vmul.f32 %v108_v41, %v94_v38 }
  0x4b   :  { %v111_v47 = vsub.f32 1.0, %v105_v45  ;;  %v115_v50 = vmul.f32 %v109_v44, %v95_v42 }
  0x4c   :  { %v112_v49 = vsel %vm106_vm2, %v110_v46, %v104_v43 }
  0x4d   :  { %v113_v51 = vsel %vm107_vm4, %v111_v47, %v105_v45  ;;  %v116_v52 = vmul.f32 %v112_v49, %v112_v49 }
  0x4e   :  { %v117_v53 = vmul.f32 %v113_v51, %v113_v51 }
  0x4f   :  { %v118_v54 = vmul.f32 %v116_v52, %v114_v48 }
  0x50   :  { %v119_v55 = vmul.f32 %v117_v53, %v115_v50 }
  0x52   :  { %v120_v56 = vadd.f32 %v119_v55, %v118_v54 }
  0x54   :  { %122 = vst [vmem:[#allocation7] sm:$0xff] %v120_v56 }
  0x55   :  { %212 = shalt.err (!%p209_p6)
}
  0x56   :  { %s213_s10 = scalar_lea.hbm %s298_s2, 128 }
  0x57   :  { %p214_p7 = scmp.ne.s32.totalorder %s298_s2, %s213_s10  ;;  %p217_p8 = scmp.lt.u32.totalorder %s213_s10, %s298_s2 }
  0x59   :  { %p219_p9 = pnand %p217_p8, %p214_p7 }
  0x5b   :  { %222 = shalt.err (!%p219_p9)
}
  0x5c   :  { %132 = dma.vmem_to_hbm [thread:$0]  %s130_s6, 128, %s298_s2, [#allocation4]  }
  0x5d   :  { %227 = dma.done.wait [#allocation4], 128  }
  0x5e   :  { %228 = vsyncadd [#allocation4], 4294967168 }
  0x5f   :  { %136 = vsyncpa [#allocation3], 1 }
  0x60   :  { %137 = vsyncpa [#allocation6], 1 }
  0x61   :  { %138 = vsyncpa [#allocation4], 1 }

</bundles_post_ra>
